<compile_context>
chip_gen: v7x
topology: tpu7x:2x2x1
jax: 0.10.0
libtpu: 0.0.40
codegen_flags: <defaults>
</compile_context>

<pallas_src>
import functools

import jax
import jax.numpy as jnp
from jax.experimental import pallas as pl
from jax.experimental.pallas import tpu as pltpu


# ----------------------------------------------------------------------------
# Generation-aware VMEM budgets
# ----------------------------------------------------------------------------
def _detect_vmem_capacity_bytes():
    try:
        return int(pltpu.get_tpu_info().vmem_capacity_bytes)
    except Exception:
        return 64 * 1024 * 1024          # conservative (v7x-sized) fallback


_VMEM_PHYS_BYTES = _detect_vmem_capacity_bytes()
if _VMEM_PHYS_BYTES >= 96 * 1024 * 1024:       # v5e / v6e (128 MiB per core)
    _VMEM_LIMIT_BYTES = 100 * 1024 * 1024
    _KERNEL_VMEM_BUDGET = 96 * 1024 * 1024
else:                                          # v7x (64 MiB per core) / unknown
    _VMEM_LIMIT_BYTES = 40 * 1024 * 1024
    _KERNEL_VMEM_BUDGET = 36 * 1024 * 1024

_TM_MATMUL = 512          # M tile for the matmul path when M is large
_TM_SINGLE_BLOCK = 1024   # below this, one block per level (no per-step overhead)
_TM3_CAP = 4096           # max flattened rows per fused-3x3 output tile


def _round_up(x, m):
    return ((x + m - 1) // m) * m


# ----------------------------------------------------------------------------
# Pallas kernels
# ----------------------------------------------------------------------------
def _mm_bias_kernel(x_ref, w_ref, b_ref, o_ref):
    """One M-tile: out = x @ w + b (bf16 operands, f32 accumulate)."""
    acc = jnp.dot(x_ref[...], w_ref[...], preferred_element_type=jnp.float32)
    o_ref[...] = (acc + b_ref[...]).astype(o_ref.dtype)


def _mm_bias_lat_kernel(x_ref, w_ref, b_ref, lat_ref, o_ref):
    """One M-tile: out = x @ w + b + lateral (lateral read as bf16, upcast here)."""
    acc = jnp.dot(x_ref[...], w_ref[...], preferred_element_type=jnp.float32)
    acc = acc + b_ref[...] + lat_ref[...].astype(jnp.float32)
    o_ref[...] = acc.astype(o_ref.dtype)


def _conv3x3_kernel(xf_hbm, w_ref, b_ref, o_ref, xbuf, sem, acc_ref, *,
                    wp, tm, l_tile, lin, t_per_img):
    """Fused 3x3 / stride-1 / pad-1 conv, M-tiled with a manually DMA'd halo.

    xf_hbm : (N*lin, Cin) bf16 in HBM. Per image: zero-padded (Hp, Wp) image,
             spatially flattened row-major with row pitch wp (multiple of 8),
             plus 8 trailing garbage elements (lin = Hp*wp + 8).
    Grid    : one step per (image, row-tile); tm = tr*wp flattened output rows.
    xbuf    : (2, l_tile, Cin) bf16 double buffer, l_tile = tm + 2*wp + 8.
    Output  : (N*H*wp, Cout) bf16, columns >= W of each row are garbage
              (cropped by the caller together with the final transpose).
    """
    step = pl.program_id(0)
    num_steps = pl.num_programs(0)
    slot = step % 2

    def make_copy(s, dst_slot):
        n = s // t_per_img
        t = s - n * t_per_img
        start = pl.multiple_of(n * lin + t * tm, 8)
        return pltpu.make_async_copy(
            xf_hbm.at[pl.ds(start, l_tile)], xbuf.at[dst_slot], sem.at[dst_slot])

    # Prime the pipeline at the very first step.
    @pl.when(step == 0)
    def _():
        make_copy(step, slot).start()

    # Wait for the current tile (issued at the previous step, or just above).
    make_copy(step, slot).wait()

    # Prefetch the next tile into the other buffer while we compute.
    @pl.when(step + 1 < num_steps)
    def _():
        make_copy(step + 1, 1 - slot).start()

    # 9-tap accumulation: shifted VMEM reads feed the MXU, f32 scratch acc.
    for idx in range(9):
        dy, dx = divmod(idx, 3)
        tap = xbuf[slot, pl.ds(dy * wp + dx, tm), :]
        part = jnp.dot(tap, w_ref[idx], preferred_element_type=jnp.float32)
        if idx == 0:
            acc_ref[...] = part
        else:
            acc_ref[...] += part
    o_ref[...] = (acc_ref[...] + b_ref[...]).astype(o_ref.dtype)


# ----------------------------------------------------------------------------
# Matmul (+ bias, + fused lateral) wrapper
# ----------------------------------------------------------------------------
def _mm_vmem_bytes(tm, k, cout, has_lateral):
    b = 2 * tm * k * 2            # double-buffered bf16 x tile
    b += 2 * k * cout * 2         # weights (conservatively double-buffered)
    b += 2 * tm * cout * 4        # output tile (worst case f32)
    if has_lateral:
        b += 2 * tm * cout * 2
    return b + 2 * cout * 4 + (1 << 16)


def _choose_tm(m, k, cout, has_lateral):
    """Single block for small levels (no per-step overhead on 1-TC chips);
    512-row tiles for large M, shrunk if the VMEM estimate exceeds budget."""
    if (m <= _TM_SINGLE_BLOCK
            and _mm_vmem_bytes(m, k, cout, has_lateral) <= _KERNEL_VMEM_BUDGET):
        return m
    tm = _TM_MATMUL
    while tm > 8 and _mm_vmem_bytes(tm, k, cout, has_lateral) > _KERNEL_VMEM_BUDGET:
        tm //= 2
    return tm


def pallas_matmul_bias(x, w2d, bias, lateral=None, out_dtype=jnp.bfloat16):
    """x: (M, K), w2d: (K, Cout), bias: (Cout,), lateral: (M, Cout) or None.

    MXU operands are bf16, accumulation and the bias/lateral adds are f32; the
    output is written in `out_dtype` (bf16 for intermediates, f32 for finals).
    """
    m, k = x.shape
    cout = w2d.shape[1]
    x = x.astype(jnp.bfloat16)
    w2d = w2d.astype(jnp.bfloat16)
    b2 = bias.reshape(1, cout).astype(jnp.float32)

    has_lat = lateral is not None
    tm = _choose_tm(m, k, cout, has_lat)
    mp = _round_up(m, tm)
    if mp != m:
        x = jnp.pad(x, ((0, mp - m), (0, 0)))
        if has_lat:
            lateral = jnp.pad(lateral, ((0, mp - m), (0, 0)))

    in_specs = [
        pl.BlockSpec((tm, k), lambda i: (i, 0)),
        pl.BlockSpec((k, cout), lambda i: (0, 0)),   # weights resident in VMEM
        pl.BlockSpec((1, cout), lambda i: (0, 0)),   # bias resident in VMEM
    ]
    args = [x, w2d, b2]
    if has_lat:
        in_specs.append(pl.BlockSpec((tm, cout), lambda i: (i, 0)))
        args.append(lateral.astype(jnp.bfloat16))
        kernel = _mm_bias_lat_kernel
    else:
        kernel = _mm_bias_kernel

    out_itemsize = jnp.dtype(out_dtype).itemsize
    bytes_accessed = (mp * k * 2 + k * cout * 2 + cout * 4
                      + mp * cout * out_itemsize
                      + (mp * cout * 2 if has_lat else 0))

    out = pl.pallas_call(
        kernel,
        out_shape=jax.ShapeDtypeStruct((mp, cout), out_dtype),
        grid=(mp // tm,),
        in_specs=in_specs,
        out_specs=pl.BlockSpec((tm, cout), lambda i: (i, 0)),
        compiler_params=pltpu.CompilerParams(
            dimension_semantics=("parallel",),
            vmem_limit_bytes=_VMEM_LIMIT_BYTES),
        cost_estimate=pl.CostEstimate(
            flops=2 * mp * k * cout,
            transcendentals=0,
            bytes_accessed=int(bytes_accessed)),
    )(*args)
    if mp != m:
        out = out[:m]
    return out


# ----------------------------------------------------------------------------
# Convolutions
# ----------------------------------------------------------------------------
def conv1x1(x_nhwc, weight, bias, lateral_nhwc=None):
    """1x1 conv (optionally fused with the FPN lateral add). Emits bf16."""
    n, h, w, cin = x_nhwc.shape
    cout = weight.shape[-1]
    x2 = x_nhwc.reshape(n * h * w, cin)
    lat2 = None
    if lateral_nhwc is not None:
        lat2 = lateral_nhwc.reshape(n * h * w, cout)
    out = pallas_matmul_bias(x2, weight.reshape(cin, cout), bias, lateral=lat2,
                             out_dtype=jnp.bfloat16)
    return out.reshape(n, h, w, cout)


def _im2col_nhwc(x, kh, kw, stride, padding):
    """x: (N, H, W, C) -> patches (N*Ho*Wo, kh*kw*C) in (kh, kw, C) order."""
    n, h, w, c = x.shape
    xp = jnp.pad(x, ((0, 0), (padding, padding), (padding, padding), (0, 0)))
    ho = (h + 2 * padding - kh) // stride + 1
    wo = (w + 2 * padding - kw) // stride + 1
    cols = []
    for i in range(kh):
        for j in range(kw):
            patch = xp[:, i:i + stride * (ho - 1) + 1:stride,
                       j:j + stride * (wo - 1) + 1:stride, :]
            cols.append(patch)
    patches = jnp.concatenate(cols, axis=-1)
    return patches.reshape(n * ho * wo, kh * kw * c), (n, ho, wo)


def conv_im2col(x_nhwc, weight, bias, stride, padding, out_dtype=jnp.float32):
    """General conv via im2col + Pallas matmul — used only for the tiny
    stride-2 levels (p6 / p7). Patches are built in bf16."""
    kh, kw, cin, cout = weight.shape
    patches, (n, ho, wo) = _im2col_nhwc(x_nhwc.astype(jnp.bfloat16),
                                        kh, kw, stride, padding)
    out = pallas_matmul_bias(patches, weight.reshape(kh * kw * cin, cout), bias,
                             out_dtype=out_dtype)
    return out.reshape(n, ho, wo, cout)


def _choose_tr(h, wp, cin, cout, budget):
    """Pick output rows per fused-3x3 tile: largest divisor of h with
    tr*wp <= _TM3_CAP and a VMEM estimate within budget."""
    best = 1
    for tr in range(1, h + 1):
        if h % tr:
            continue
        tm = tr * wp
        if tm > _TM3_CAP:
            break
        l_tile = tm + 2 * wp + 8
        est = (2 * l_tile * cin * 2        # double-buffered bf16 input halo tile
               + tm * cout * 4             # f32 accumulator scratch
               + 2 * tm * cout * 2         # double-buffered bf16 output tile
               + 2 * 9 * cin * cout * 2    # resident weights (2 bufs, worst case)
               + 2 * cout * 4 + (1 << 16))
        if est <= budget:
            best = tr
    return best


def conv3x3_s1p1(x_nhwc, weight, bias):
    """3x3 / stride-1 / pad-1 conv via the fused, halo-tiled Pallas kernel.
    Returns the cropped NHWC result in bf16."""
    n, h, w, cin = x_nhwc.shape
    cout = weight.shape[-1]
    wp = _round_up(w + 2, 8)          # sublane-aligned row pitch
    hp = h + 2
    lin = hp * wp + 8                 # per-image flat length (+8 trailing zeros)

    tr = _choose_tr(h, wp, cin, cout, _KERNEL_VMEM_BUDGET)
    tm = tr * wp
    t_per_img = h // tr
    l_tile = tm + 2 * wp + 8
    s_total = n * t_per_img

    xb = x_nhwc.astype(jnp.bfloat16)
    xpad = jnp.pad(xb, ((0, 0), (1, 1), (1, wp - w - 1), (0, 0)))
    xf = jnp.pad(xpad.reshape(n, hp * wp, cin), ((0, 0), (0, 8), (0, 0)))
    xf = xf.reshape(n * lin, cin)
    w9 = weight.reshape(9, cin, cout).astype(jnp.bfloat16)
    b2 = bias.reshape(1, cout).astype(jnp.float32)

    kernel = functools.partial(_conv3x3_kernel, wp=wp, tm=tm, l_tile=l_tile,
                               lin=lin, t_per_img=t_per_img)
    out = pl.pallas_call(
        kernel,
        out_shape=jax.ShapeDtypeStruct((n * h * wp, cout), jnp.bfloat16),
        grid=(s_total,),
        in_specs=[
            pl.BlockSpec(memory_space=pl.ANY),                 # flat image, HBM
            pl.BlockSpec((9, cin, cout), lambda s: (0, 0, 0)),  # resident weights
            pl.BlockSpec((1, cout), lambda s: (0, 0)),          # resident bias
        ],
        out_specs=pl.BlockSpec((tm, cout), lambda s: (s, 0)),
        scratch_shapes=[
            pltpu.VMEM((2, l_tile, cin), jnp.bfloat16),  # input double buffer
            pltpu.SemaphoreType.DMA((2,)),               # per-slot DMA sems
            pltpu.VMEM((tm, cout), jnp.float32),         # f32 tap accumulator
        ],
        compiler_params=pltpu.CompilerParams(
            dimension_semantics=("arbitrary",),   # cross-step DMA prefetch chain
            vmem_limit_bytes=_VMEM_LIMIT_BYTES),
        cost_estimate=pl.CostEstimate(
            flops=2 * 9 * cin * cout * n * h * wp,
            transcendentals=0,
            bytes_accessed=int(n * lin * cin * 2 + 9 * cin * cout * 2
                               + cout * 4 + n * h * wp * cout * 2)),
    )(xf, w9, b2)
    # Crop the garbage columns (>= W of each flattened row); the caller fuses
    # this slice with the final cast + NCHW transpose.
    return out.reshape(n, h, wp, cout)[:, :, :w, :]


def upsample_nearest_x2(x_nhwc):
    return jnp.repeat(jnp.repeat(x_nhwc, 2, axis=1), 2, axis=2)


# ----------------------------------------------------------------------------
# FPN parameters and forward
# ----------------------------------------------------------------------------
def init_fpn_params(key, c_input_channels, fpn_output_channels=256):
    c3_in, c4_in, c5_in = c_input_channels
    specs = {
        "p5_input": (1, 1, c5_in, fpn_output_channels),
        "p5_output": (3, 3, fpn_output_channels, fpn_output_channels),
        "p4_input": (1, 1, c4_in, fpn_output_channels),
        "p4_output": (3, 3, fpn_output_channels, fpn_output_channels),
        "p3_input": (1, 1, c3_in, fpn_output_channels),
        "p3_output": (3, 3, fpn_output_channels, fpn_output_channels),
        "p6_output": (3, 3, c5_in, fpn_output_channels),
        "p7_output": (3, 3, fpn_output_channels, fpn_output_channels),
    }
    params = {}
    keys = jax.random.split(key, 2 * len(specs))
    for idx, (name, shp) in enumerate(sorted(specs.items())):
        wk, bk = keys[2 * idx], keys[2 * idx + 1]
        params[name] = {
            "w": 0.05 * jax.random.normal(wk, shp, dtype=jnp.float32),
            "b": 0.05 * jax.random.normal(bk, (shp[-1],), dtype=jnp.float32),
        }
    return params


def fpn_forward(params, inputs_nchw):
    """inputs_nchw: [c3, c4, c5] each NCHW. Returns 5 NCHW f32 feature maps."""
    # NCHW -> NHWC and cast to bf16 in one fused XLA pass per input.
    c3, c4, c5 = [jnp.transpose(x, (0, 2, 3, 1)).astype(jnp.bfloat16)
                  for x in inputs_nchw]
    p = params

    p5_input_f = conv1x1(c5, p["p5_input"]["w"], p["p5_input"]["b"])
    p5_unsample_f = upsample_nearest_x2(p5_input_f)          # bf16
    p5_output_f = conv3x3_s1p1(p5_input_f, p["p5_output"]["w"],
                               p["p5_output"]["b"])

    # Lateral add fused into the 1x1 conv epilogue (bf16 lateral, f32 add).
    p4_input_f = conv1x1(c4, p["p4_input"]["w"], p["p4_input"]["b"],
                         lateral_nhwc=p5_unsample_f)
    p4_unsample_f = upsample_nearest_x2(p4_input_f)
    p4_output_f = conv3x3_s1p1(p4_input_f, p["p4_output"]["w"],
                               p["p4_output"]["b"])

    p3_input_f = conv1x1(c3, p["p3_input"]["w"], p["p3_input"]["b"],
                         lateral_nhwc=p4_unsample_f)
    # NOTE: the reference forward (re)uses self.p5_output for p3 — reproduced.
    p3_output_f = conv3x3_s1p1(p3_input_f, p["p5_output"]["w"],
                               p["p5_output"]["b"])

    p6_output_f = conv_im2col(c5, p["p6_output"]["w"], p["p6_output"]["b"],
                              stride=2, padding=1, out_dtype=jnp.float32)
    p7_input_f = jnp.maximum(p6_output_f, 0.0)               # p7_before = ReLU
    p7_output_f = conv_im2col(p7_input_f, p["p7_output"]["w"],
                              p["p7_output"]["b"], stride=2, padding=1,
                              out_dtype=jnp.float32)

    outs_nhwc = [p3_output_f, p4_output_f, p5_output_f, p6_output_f, p7_output_f]
    # Final crop (already applied), f32 upcast and NCHW transpose fuse in XLA.
    return [jnp.transpose(o.astype(jnp.float32), (0, 3, 1, 2)) for o in outs_nhwc]


# ----------------------------------------------------------------------------
# Pure-JAX reference (for correctness checking only)
# ----------------------------------------------------------------------------
def _conv_ref(x, w, b, stride, padding):
    out = jax.lax.conv_general_dilated(
        x, w, window_strides=(stride, stride),
        padding=((padding, padding), (padding, padding)),
        dimension_numbers=("NHWC", "HWIO", "NHWC"),
        precision=jax.lax.Precision.HIGHEST)
    return out + b.reshape(1, 1, 1, -1)


def fpn_forward_reference(params, inputs_nchw):
    c3, c4, c5 = [jnp.transpose(x, (0, 2, 3, 1)) for x in inputs_nchw]
    p = params
    p5_in = _conv_ref(c5, p["p5_input"]["w"], p["p5_input"]["b"], 1, 0)
    p5_up = upsample_nearest_x2(p5_in)
    p5_out = _conv_ref(p5_in, p["p5_output"]["w"], p["p5_output"]["b"], 1, 1)
    p4_in = _conv_ref(c4, p["p4_input"]["w"], p["p4_input"]["b"], 1, 0) + p5_up
    p4_up = upsample_nearest_x2(p4_in)
    p4_out = _conv_ref(p4_in, p["p4_output"]["w"], p["p4_output"]["b"], 1, 1)
    p3_in = _conv_ref(c3, p["p3_input"]["w"], p["p3_input"]["b"], 1, 0) + p4_up
    p3_out = _conv_ref(p3_in, p["p5_output"]["w"], p["p5_output"]["b"], 1, 1)
    p6_out = _conv_ref(c5, p["p6_output"]["w"], p["p6_output"]["b"], 2, 1)
    p7_out = _conv_ref(jnp.maximum(p6_out, 0.0), p["p7_output"]["w"],
                       p["p7_output"]["b"], 2, 1)
    outs = [p3_out, p4_out, p5_out, p6_out, p7_out]
    return [jnp.transpose(o, (0, 3, 1, 2)) for o in outs]


# ----------------------------------------------------------------------------
# Main
# ----------------------------------------------------------------------------
if __name__ == "__main__":
    key = jax.random.PRNGKey(0)
    k_par, k3, k4, k5 = jax.random.split(key, 4)

    # Small shapes consistent with an FPN pyramid (NCHW like PyTorch).
    batch = 2
    c_input_channels = (8, 16, 32)
    fpn_out = 32
    c3 = jax.random.normal(k3, (batch, c_input_channels[0], 16, 16), jnp.float32)
    c4 = jax.random.normal(k4, (batch, c_input_channels[1], 8, 8), jnp.float32)
    c5 = jax.random.normal(k5, (batch, c_input_channels[2], 4, 4), jnp.float32)

    params = init_fpn_params(k_par, c_input_channels, fpn_out)

    outs = fpn_forward(params, [c3, c4, c5])
    outs = [jax.block_until_ready(o) for o in outs]

    expected = [
        (batch, fpn_out, 16, 16),  # p3
        (batch, fpn_out, 8, 8),    # p4
        (batch, fpn_out, 4, 4),    # p5
        (batch, fpn_out, 2, 2),    # p6
        (batch, fpn_out, 1, 1),    # p7
    ]
    assert [tuple(o.shape) for o in outs] == expected, \
        [tuple(o.shape) for o in outs]
    assert all(bool(jnp.all(jnp.isfinite(o))) for o in outs)

    # Numerical check vs. a full-precision XLA reference (bf16 MXU operands and
    # bf16 intermediates in the Pallas path => loose-but-tight-enough tolerance).
    refs = fpn_forward_reference(params, [c3, c4, c5])
    for o, r in zip(outs, refs):
        max_err = float(jnp.max(jnp.abs(o - r)))
        assert max_err < 5e-2, f"max abs error {max_err}"

    print("KERNEL_OK")
</pallas_src>

<mosaic_0001>
module attributes {stable_mosaic.version = 11 : i64} {
  func.func @_mm_bias_kernel(%arg0: i32, %arg1: memref<32x32xbf16, #tpu.memory_space<vmem>>, %arg2: memref<32x32xbf16, #tpu.memory_space<vmem>>, %arg3: memref<1x32xf32, #tpu.memory_space<vmem>>, %arg4: memref<32x32xbf16, #tpu.memory_space<vmem>>) attributes {dimension_semantics = [#tpu.dimension_semantics<parallel>], iteration_bounds = array<i64: 1>, scalar_prefetch = 0 : i64, scratch_operands = 0 : i64, tpu.core_type = #tpu.core_type<tc>, window_params = [{transform_indices = @transform_0, window_bounds = array<i64: 32, 32>}, {pipeline_mode = #tpu.pipeline_mode<synchronous>, transform_indices = @transform_1, window_bounds = array<i64: 32, 32>}, {pipeline_mode = #tpu.pipeline_mode<synchronous>, transform_indices = @transform_2, window_bounds = array<i64: 1, 32>}, {transform_indices = @transform_3, window_bounds = array<i64: 32, 32>}]} {
    %c0 = arith.constant 0 : index
    %c0_0 = arith.constant 0 : index
    %0 = vector.load %arg1[%c0, %c0_0] : memref<32x32xbf16, #tpu.memory_space<vmem>>, vector<32x32xbf16>
    %c0_1 = arith.constant 0 : index
    %c0_2 = arith.constant 0 : index
    %1 = vector.load %arg2[%c0_1, %c0_2] : memref<32x32xbf16, #tpu.memory_space<vmem>>, vector<32x32xbf16>
    %cst = arith.constant dense<0.000000e+00> : vector<32x32xf32>
    %2 = tpu.matmul %0, %1, %cst {dimension_numbers = #tpu.dot_dimension_numbers<[1], [0], [0], [1], [0, 0, 1, 1], [], []>} : vector<32x32xbf16>, vector<32x32xbf16>, vector<32x32xf32> -> vector<32x32xf32>
    %c0_3 = arith.constant 0 : index
    %c0_4 = arith.constant 0 : index
    %3 = vector.load %arg3[%c0_3, %c0_4] : memref<1x32xf32, #tpu.memory_space<vmem>>, vector<1x32xf32>
    %4 = vector.broadcast %3 : vector<1x32xf32> to vector<32x32xf32>
    %5 = arith.addf %2, %4 : vector<32x32xf32>
    %6 = arith.truncf %5 : vector<32x32xf32> to vector<32x32xbf16>
    %c0_5 = arith.constant 0 : index
    %c0_6 = arith.constant 0 : index
    %7 = vector.load %arg4[%c0_5, %c0_6] : memref<32x32xbf16, #tpu.memory_space<vmem>>, vector<32x32xbf16>
    tpu.vector_store %arg4[%c0_5, %c0_6], %6 {strides = array<i32>} : memref<32x32xbf16, #tpu.memory_space<vmem>>, vector<32x32xbf16>,
    return
  }
  func.func @transform_0(%arg0: i32) -> (i32, i32) {
    %c0_i32 = arith.constant 0 : i32
    %c0_i32_0 = arith.constant 0 : i32
    return %arg0, %c0_i32 : i32, i32
  }
  func.func @transform_1(%arg0: i32) -> (i32, i32) {
    %c0_i32 = arith.constant 0 : i32
    %c0_i32_0 = arith.constant 0 : i32
    %c0_i32_1 = arith.constant 0 : i32
    return %c0_i32, %c0_i32_0 : i32, i32
  }
  func.func @transform_2(%arg0: i32) -> (i32, i32) {
    %c0_i32 = arith.constant 0 : i32
    %c0_i32_0 = arith.constant 0 : i32
    %c0_i32_1 = arith.constant 0 : i32
    return %c0_i32, %c0_i32_0 : i32, i32
  }
  func.func @transform_3(%arg0: i32) -> (i32, i32) {
    %c0_i32 = arith.constant 0 : i32
    %c0_i32_0 = arith.constant 0 : i32
    return %arg0, %c0_i32 : i32, i32
  }
}

</mosaic_0001>

<bundles_post_ra>
// kernel: tpu_custom_call.1
= control target key start
LH: loop header
LB: loop body
LE: loop exit
PB: predicated region body
PF: predicated region fallthrough
CT: control target
= control target key end

     0   :  { %8 = vsyncpa [#allocation3], 0  ;;  %s361_s0 = inlined_call_operand.hbm [shape: bf16[32,32], index: 0, kind: input, shape index: {}]   ;;  %s362_s1 = inlined_call_operand.hbm [shape: bf16[32,32], index: 1, kind: input, shape index: {}]   ;;  %s363_s2 = inlined_call_operand.vmem [shape: f32[1,32], index: 2, kind: input, shape index: {}]   ;;  %s364_s3 = inlined_call_operand.hbm [shape: bf16[32,32], index: 3, kind: output, shape index: {}]  }
   0x1   :  { %9 = vsyncpa [#allocation6], 0 }
   0x2   :  { %10 = vsyncpa [#allocation4], 0  ;;  %s284_s12 = smov [#allocation2]   ;;  %s212_s16 = scalar_lea.hbm %s361_s0, 256 }
   0x3   :  { %s16_s13 = sshll.u32 %s284_s12, 4  ;;  %p213_p0 = scmp.ne.s32.totalorder %s361_s0, %s212_s16  ;;  %s17_s13 = int_to_ptr.vmem [resolvable:$true] %s16_s13 }
   0x4   :  { %p216_p1 = scmp.lt.u32.totalorder %s212_s16, %s361_s0 }
   0x6   :  { %p218_p2 = pnand %p216_p1, %p213_p0 }
   0x8   :  { %221 = shalt.err (!%p218_p2)
}
   0x9   :  { %s222_s21 = scalar_lea.vmem %s17_s13, 256  ;;  %p227_p4 = scmp.lt.s32.totalorder %s17_s13, %s17_s13 }
   0xa   :  { %p223_p3 = scmp.ne.s32.totalorder %s17_s13, %s222_s21  ;;  %p228_p5 = scmp.lt.s32.totalorder %s222_s21, %s222_s21 }
   0xc   :  { %p229_p6 = por %p228_p5, %p227_p4 }
   0xe   :  { %p230_p7 = pnand %p229_p6, %p223_p3 }
  0x10   :  { %233 = shalt.err (!%p230_p7)
}
  0x11   :  { %s285_s22 = smov 64   ;;  %s286_s23 = smov 4  }
  0x12   :  { %22 = dma.hbm_to_vmem [thread:$0]  %s361_s0, 256, %s17_s13, [#allocation3], %s285_s22, %s285_s22, %s286_s23  }
  0x13   :  { %s287_s26 = smov [#allocation5]   ;;  %s234_s30 = scalar_lea.hbm %s362_s1, 256 }
  0x14   :  { %s28_s27 = sshll.u32 %s287_s26, 4  ;;  %p235_p8 = scmp.ne.s32.totalorder %s362_s1, %s234_s30  ;;  %s29_s27 = int_to_ptr.vmem [resolvable:$true] %s28_s27 }
  0x15   :  { %p238_p9 = scmp.lt.u32.totalorder %s234_s30, %s362_s1 }
  0x17   :  { %p240_p10 = pnand %p238_p9, %p235_p8 }
  0x19   :  { %243 = shalt.err (!%p240_p10)
}
  0x1a   :  { %s244_s8 = scalar_lea.vmem %s29_s27, 256  ;;  %p249_p12 = scmp.lt.s32.totalorder %s29_s27, %s29_s27 }
  0x1b   :  { %p245_p11 = scmp.ne.s32.totalorder %s29_s27, %s244_s8  ;;  %p250_p13 = scmp.lt.s32.totalorder %s244_s8, %s244_s8 }
  0x1d   :  { %p251_p0 = por %p250_p13, %p249_p12 }
  0x1f   :  { %p252_p1 = pnand %p251_p0, %p245_p11 }
  0x21   :  { %255 = shalt.err (!%p252_p1)
}
  0x22   :  { %34 = dma.hbm_to_vmem [thread:$0]  %s362_s1, 256, %s29_s27, [#allocation6], %s285_s22, %s285_s22, %s286_s23  }
  0x23   :  { %278 = dma.done.wait [#allocation3], 256  }
  0x24   :  { %279 = vsyncadd [#allocation3], 4294967040 }
  0x25   :  { %280 = dma.done.wait [#allocation6], 256  }
  0x26   :  { %281 = vsyncadd [#allocation6], 4294967040  ;;  %v208_v0 = vld [vmem:[#allocation5] sm:$0xff]   ;;  %v209_v1 = vld [vmem:[#allocation5 + $0x8] sm:$0xff]   ;;  %vm81_vm0 = vcmask 261120   ;;  %vm153_vm1 = vcmask 257024  }
  0x27   :  { %195 = vmatprep.subr.bf16.mxu0 %v208_v0  ;;  %v210_v2 = vld [vmem:[#allocation2] sm:$0xff]   ;;  %v211_v3 = vld [vmem:[#allocation2 + $0x8] sm:$0xff]   ;;  %s288_s1 = smov [#allocation7]  }
  0x28   :  { %196 = vmatpush3.bf16.msra.mxu0 %v208_v0  ;;  %199 = vmatprep.mubr.msk.bf16.mxu0 %vm81_vm0, %v210_v2  ;;  %v176_v4 = vld [vmem:[%s363_s2] ss:$0 sm:$0xff]  ;;  %s163_s12 = sshll.u32 %s288_s1, 4  ;;  %s164_s12 = int_to_ptr.vmem [resolvable:$true] %s163_s12 }
  0x29   :  { %197 = vmatprep.subr.bf16.mxu0 %v209_v1  ;;  %s256_s2 = scalar_lea.vmem %s164_s12, 256  ;;  %p261_p3 = scmp.lt.s32.totalorder %s164_s12, %s164_s12 }
  0x2a   :  { %p257_p2 = scmp.ne.s32.totalorder %s164_s12, %s256_s2  ;;  %p262_p4 = scmp.lt.s32.totalorder %s256_s2, %s256_s2 }
  0x2c   :  { %198 = vmatpush3.bf16.msra.mxu0 %v209_v1  ;;  %p263_p5 = por %p262_p4, %p261_p3 }
  0x2e   :  { %p264_p6 = pnand %p263_p5, %p257_p2 }
  0x2f   :  { %200 = vmatmul.mubr.msk.bf16.vlgmr.msra.gmra.mrb[0].mxu0 %vm81_vm0, %v211_v3 }
 0x102   :  { %v201_v5 = vpop.f32.mrb[0].mxu0 }
 0x103   :  { %v131_v6 = vadd.f32 %v201_v5, %v176_v4  ;;  %v122_v7 = vpop.f32.mrb[1].mxu0 }
 0x104   :  { %v123_v8 = vadd.f32 %v176_v4, %v122_v7  ;;  %v202_v9 = vpop.f32.mrb[2].mxu0 }
 0x105   :  { %v189_v10 = vpack.c.bf16 %v131_v6, %v131_v6  ;;  %v134_v11 = vadd.f32 %v202_v9, %v176_v4  ;;  %v125_v12 = vpop.f32.mrb[3].mxu0 }
 0x106   :  { %v187_v13 = vpack.c.bf16 %v123_v8, %v123_v8  ;;  %v126_v14 = vadd.f32 %v176_v4, %v125_v12 }
 0x107   :  { %156 = vst.msk [vmem:[#allocation7 + $0x8] sm:$0xf] %vm153_vm1, %v189_v10  ;;  %v190_v15 = vpack.c.bf16 %v134_v11, %v134_v11 }
 0x108   :  { %154 = vst.msk [vmem:[#allocation7] sm:$0xf] %vm153_vm1, %v187_v13  ;;  %v188_v16 = vpack.c.bf16 %v126_v14, %v126_v14 }
 0x109   :  { %157 = vst.msk [vmem:[#allocation7 + $0xc] sm:$0xf] %vm153_vm1, %v190_v15 }
 0x10a   :  { %155 = vst.msk [vmem:[#allocation7 + $0x4] sm:$0xf] %vm153_vm1, %v188_v16 }
 0x10b   :  { %267 = shalt.err (!%p264_p6)
}
 0x10c   :  { %s268_s15 = scalar_lea.hbm %s364_s3, 256 }
 0x10d   :  { %p269_p7 = scmp.ne.s32.totalorder %s364_s3, %s268_s15  ;;  %p272_p8 = scmp.lt.u32.totalorder %s268_s15, %s364_s3 }
 0x10f   :  { %p274_p9 = pnand %p272_p8, %p269_p7 }
 0x111   :  { %277 = shalt.err (!%p274_p9)
}
 0x112   :  { %169 = dma.vmem_to_hbm [thread:$0]  %s164_s12, 256, %s364_s3, [#allocation4], %s285_s22, %s285_s22, %s286_s23  }
 0x113   :  { %282 = dma.done.wait [#allocation4], 256  }
 0x114   :  { %283 = vsyncadd [#allocation4], 4294967040 }
 0x115   :  { %173 = vsyncpa [#allocation3], 1 }
 0x116   :  { %174 = vsyncpa [#allocation6], 1 }
 0x117   :  { %175 = vsyncpa [#allocation4], 1 }

</bundles_post_ra>
